<compile_context>
chip_gen: v7x
topology: tpu7x:2x2x1
jax: 0.10.0
libtpu: 0.0.40
codegen_flags: <defaults>
</compile_context>

<pallas_src>
import functools
import math

import numpy as np
import jax
import jax.numpy as jnp
from jax.experimental import pallas as pl
from jax.experimental.pallas import tpu as pltpu


# Abramowitz & Stegun 4.4.46: arcsin(x) = pi/2 - sqrt(1-x) * poly(x), x in [0,1].
_ASIN_COEFFS = (1.5707963050, -0.2145988016, 0.0889789874, -0.0501743046,
                0.0308918810, -0.0170881256, 0.0066700901, -0.0012624911)


def _asin01(x):
    """arcsin(x) for x in [0, 1]; polynomial approx, |err| <= 2e-8."""
    p = jnp.full_like(x, _ASIN_COEFFS[-1])
    for c in reversed(_ASIN_COEFFS[:-1]):
        p = p * x + c
    return (math.pi / 2.0) - jnp.sqrt(jnp.maximum(1.0 - x, 0.0)) * p


def _prompt_kernel(w_ref, x_ref, e_ref, out_ref, e_n_ref, acc_ref,
                   *, n_rows, n_embed, block_rows, blocks_per_core):
    c = pl.program_id(0)            # core / outer parallel axis
    j = pl.program_id(1)            # row-block axis (reduction, "arbitrary")
    block_idx = c * blocks_per_core + j

    eps_sq = 1e-24                  # == (F.normalize eps)^2, clamp on the norm

    @pl.when(j == 0)
    def _init():
        acc_ref[...] = jnp.zeros_like(acc_ref)
        # Hoisted embed-side work: normalized embed computed once per core.
        e = e_ref[...].astype(jnp.float32)                        # (K, D)
        e_sq = jnp.sum(e * e, axis=-1, keepdims=True)             # (K, 1)
        e_n_ref[...] = e * jax.lax.rsqrt(jnp.maximum(e_sq, eps_sq))

    x = x_ref[...].astype(jnp.float32)                            # (R, D)
    x_sq = jnp.sum(x * x, axis=-1, keepdims=True)                 # (R, 1)
    inv_x = jax.lax.rsqrt(jnp.maximum(x_sq, eps_sq))              # EUP rsqrt

    # MXU: (R, D) x (K, D) contracted on D -> (R, K); no explicit transpose.
    sim = jax.lax.dot_general(x, e_n_ref[...], (((1,), (1,)), ((), ())),
                              preferred_element_type=jnp.float32)
    # Scale the small (R, K) tile instead of dividing the (R, D) operand.
    sim = sim * inv_x

    # For unit vectors: ||a - b|| / 2 = sqrt(2 - 2 a.b) / 2  in [0, 1].
    half_chord = 0.5 * jnp.sqrt(jnp.clip(2.0 - 2.0 * sim, 0.0, 4.0))
    dists = 2.0 * jnp.square(_asin01(jnp.minimum(half_chord, 1.0)))   # (R, K)

    # Tail mask only for blocks that can actually contain padded rows.
    has_pad = (block_idx + 1) * block_rows > n_rows

    @pl.when(jnp.logical_not(has_pad))
    def _acc_full():
        acc_ref[...] += dists

    @pl.when(has_pad)
    def _acc_masked():
        rows = (block_idx * block_rows
                + jax.lax.broadcasted_iota(jnp.int32, dists.shape, 0))
        acc_ref[...] += jnp.where(rows < n_rows, dists, 0.0)

    @pl.when(j == pl.num_programs(1) - 1)
    def _finalize():
        # abs(w) * mean(dists * sign(w)) == w * mean(dists_raw) exactly.
        w = w_ref[0]
        total = jnp.sum(acc_ref[...], axis=1, keepdims=True)          # (R, 1)
        total = jnp.sum(total, axis=0, keepdims=True)                 # (1, 1)
        out_ref[...] = total * (w * (1.0 / float(n_rows * n_embed)))


def _round_up(x, m):
    return (x + m - 1) // m * m


def prompt_forward(x, embed, weight, *, max_block_rows=2048):
    """Pallas implementation of Prompt.forward.  Returns a scalar float32."""
    x = jnp.asarray(x, jnp.float32)
    embed = jnp.asarray(embed, jnp.float32)
    w = jnp.asarray(weight, jnp.float32).reshape((1,))

    n_rows, d = x.shape
    n_embed, d2 = embed.shape
    assert d == d2, "input and embed must share the embedding dimension"

    # --- Tile sizing: as many rows as fit a conservative VMEM budget. -------
    # Budget chosen so double-buffered input + resident embed + e_n scratch +
    # (block_rows, K) accumulator stay well under the 32 MiB scoped limit we
    # request below (safe on v7x's 64 MiB physical VMEM as well).
    vmem_budget = 16 << 20
    k_lanes = _round_up(n_embed, 128)
    fixed_bytes = 3 * n_embed * d * 4              # embed (2x buffered) + e_n
    per_row_bytes = 2 * d * 4 + k_lanes * 4        # 2x buffered x row + acc row
    avail = max(vmem_budget - fixed_bytes, 8 * per_row_bytes)
    block_rows = min(max_block_rows, max(8, avail // per_row_bytes))
    block_rows = max(8, (block_rows // 8) * 8)     # sublane multiple
    block_rows = min(block_rows, _round_up(n_rows, 8))

    num_blocks_total = -(-n_rows // block_rows)
    # Leading parallel axis so v7x can use both TensorCores (serial elsewhere).
    num_cores = 2 if num_blocks_total >= 2 else 1
    blocks_per_core = -(-num_blocks_total // num_cores)
    padded_rows = num_cores * blocks_per_core * block_rows
    if padded_rows != n_rows:
        x = jnp.pad(x, ((0, padded_rows - n_rows), (0, 0)))

    kernel = functools.partial(_prompt_kernel, n_rows=n_rows, n_embed=n_embed,
                               block_rows=block_rows,
                               blocks_per_core=blocks_per_core)

    flops = (2 * padded_rows * n_embed * d           # matmul
             + 3 * padded_rows * d                   # x*x + row reduce
             + 3 * n_embed * d * num_cores           # embed normalize (once/core)
             + 30 * padded_rows * n_embed)           # chord/asin/accumulate
    bytes_accessed = 4 * (padded_rows * d + n_embed * d + num_cores + 1)
    transcendentals = padded_rows + n_embed * num_cores

    out = pl.pallas_call(
        kernel,
        out_shape=jax.ShapeDtypeStruct((num_cores, 1), jnp.float32),
        grid_spec=pltpu.PrefetchScalarGridSpec(
            num_scalar_prefetch=0,
            grid=(num_cores, blocks_per_core),
            in_specs=[
                pl.BlockSpec(memory_space=pltpu.MemorySpace.SMEM),   # weight (1,)
                pl.BlockSpec((block_rows, d),                        # input rows
                             lambda c, j: (c * blocks_per_core + j, 0)),
                pl.BlockSpec((n_embed, d), lambda c, j: (0, 0)),     # embed (resident)
            ],
            out_specs=pl.BlockSpec((1, 1), lambda c, j: (c, 0)),     # per-core partial
            scratch_shapes=[
                pltpu.VMEM((n_embed, d), jnp.float32),               # e_n (hoisted)
                pltpu.VMEM((block_rows, n_embed), jnp.float32),      # dists accumulator
            ],
        ),
        compiler_params=pltpu.CompilerParams(
            dimension_semantics=("parallel", "arbitrary"),
            vmem_limit_bytes=32 * 1024 * 1024),
        cost_estimate=pl.CostEstimate(flops=flops,
                                      transcendentals=transcendentals,
                                      bytes_accessed=bytes_accessed),
    )(w, x, embed)
    return jnp.sum(out)


def _prompt_reference(x, e, w):
    """Pure-JAX transcription of the PyTorch forward (for verification)."""
    eps = 1e-12
    xn = x / jnp.maximum(jnp.linalg.norm(x, axis=-1, keepdims=True), eps)
    en = e / jnp.maximum(jnp.linalg.norm(e, axis=-1, keepdims=True), eps)
    d = jnp.linalg.norm(xn[:, None, :] - en[None, :, :], axis=-1)
    dists = 2.0 * jnp.arcsin(d / 2.0) ** 2
    dists = dists * jnp.sign(w)
    return jnp.abs(w) * jnp.mean(dists)


if __name__ == "__main__":
    key = jax.random.PRNGKey(0)
    k1, k2, k3, k4, k5, k6 = jax.random.split(key, 6)

    prompt_jit = jax.jit(prompt_forward, static_argnames=("max_block_rows",))

    # Case 1: default weight, block-aligned batch, single block.
    B, K, D = 8, 4, 32
    x1 = jax.random.normal(k1, (B, D), dtype=jnp.float32)
    e1 = jax.random.normal(k2, (K, D), dtype=jnp.float32)
    w1 = jnp.float32(1.0)
    out1 = jax.block_until_ready(prompt_jit(x1, e1, w1))
    np.testing.assert_allclose(np.asarray(out1),
                               np.asarray(_prompt_reference(x1, e1, w1)),
                               rtol=1e-4, atol=1e-5)

    # Case 2: negative weight and a batch that needs tail-row masking.
    B2, K2 = 10, 3
    x2 = jax.random.normal(k3, (B2, D), dtype=jnp.float32)
    e2 = jax.random.normal(k4, (K2, D), dtype=jnp.float32)
    w2 = jnp.float32(-0.5)
    out2 = jax.block_until_ready(prompt_jit(x2, e2, w2))
    np.testing.assert_allclose(np.asarray(out2),
                               np.asarray(_prompt_reference(x2, e2, w2)),
                               rtol=1e-4, atol=1e-5)

    # Case 3: force small blocks to exercise the multi-block / dual-core grid,
    # the resident accumulator, and the last-block mask path.
    B3, K3 = 50, 4
    x3 = jax.random.normal(k5, (B3, D), dtype=jnp.float32)
    e3 = jax.random.normal(k6, (K3, D), dtype=jnp.float32)
    w3 = jnp.float32(2.0)
    out3 = jax.block_until_ready(prompt_jit(x3, e3, w3, max_block_rows=16))
    np.testing.assert_allclose(np.asarray(out3),
                               np.asarray(_prompt_reference(x3, e3, w3)),
                               rtol=1e-4, atol=1e-5)

    print("KERNEL_OK")
</pallas_src>

<mosaic_0001>
module attributes {stable_mosaic.version = 11 : i64} {
  func.func @_prompt_kernel(%arg0: i32, %arg1: i32, %arg2: memref<1xf32, #tpu.memory_space<smem>>, %arg3: memref<8x32xf32, #tpu.memory_space<vmem>>, %arg4: memref<4x32xf32, #tpu.memory_space<vmem>>, %arg5: memref<1x1xf32, #tpu.memory_space<vmem>>, %arg6: memref<4x32xf32, #tpu.memory_space<vmem>>, %arg7: memref<8x4xf32, #tpu.memory_space<vmem>>) attributes {dimension_semantics = [#tpu.dimension_semantics<parallel>, #tpu.dimension_semantics<arbitrary>], iteration_bounds = array<i64: 1, 1>, scalar_prefetch = 0 : i64, scratch_operands = 2 : i64, tpu.core_type = #tpu.core_type<tc>, window_params = [{transform_indices = @transform_0, window_bounds = array<i64: 1>}, {transform_indices = @transform_1, window_bounds = array<i64: 8, 32>}, {pipeline_mode = #tpu.pipeline_mode<synchronous>, transform_indices = @transform_2, window_bounds = array<i64: 4, 32>}, {transform_indices = @transform_3, window_bounds = array<i64: 1, 1>}]} {
    %c1_i32 = arith.constant 1 : i32
    %0 = arith.muli %arg0, %c1_i32 : i32
    %1 = arith.addi %0, %arg1 : i32
    %c0_i32 = arith.constant 0 : i32
    %2 = arith.cmpi eq, %arg1, %c0_i32 : i32
    %3 = arith.extui %2 : i1 to i32
    %c0_i32_0 = arith.constant 0 : i32
    %4 = arith.cmpi ne, %3, %c0_i32_0 : i32
    scf.if %4 {
      %cst_30 = arith.constant 0.000000e+00 : f32
      %73 = vector.broadcast %cst_30 : f32 to vector<8x4xf32>
      %c0_31 = arith.constant 0 : index
      %c0_32 = arith.constant 0 : index
      %74 = vector.load %arg7[%c0_31, %c0_32] : memref<8x4xf32, #tpu.memory_space<vmem>>, vector<8x4xf32>
      tpu.vector_store %arg7[%c0_31, %c0_32], %73 {strides = array<i32>} : memref<8x4xf32, #tpu.memory_space<vmem>>, vector<8x4xf32>,
      %c0_33 = arith.constant 0 : index
      %c0_34 = arith.constant 0 : index
      %75 = vector.load %arg4[%c0_33, %c0_34] : memref<4x32xf32, #tpu.memory_space<vmem>>, vector<4x32xf32>
      %76 = arith.mulf %75, %75 : vector<4x32xf32>
      %cst_35 = arith.constant dense<0.000000e+00> : vector<4xf32>
      %77 = vector.multi_reduction <add>, %76, %cst_35 [1] : vector<4x32xf32> to vector<4xf32>
      %78 = vector.shape_cast %77 : vector<4xf32> to vector<4x1xf32>
      %cst_36 = arith.constant 1.000000e-24 : f32
      %79 = vector.broadcast %cst_36 : f32 to vector<4x1xf32>
      %80 = arith.maximumf %78, %79 : vector<4x1xf32>
      %81 = math.rsqrt %80 : vector<4x1xf32>
      %82 = vector.broadcast %81 : vector<4x1xf32> to vector<4x32xf32>
      %83 = arith.mulf %75, %82 : vector<4x32xf32>
      %c0_37 = arith.constant 0 : index
      %c0_38 = arith.constant 0 : index
      %84 = vector.load %arg6[%c0_37, %c0_38] : memref<4x32xf32, #tpu.memory_space<vmem>>, vector<4x32xf32>
      tpu.vector_store %arg6[%c0_37, %c0_38], %83 {strides = array<i32>} : memref<4x32xf32, #tpu.memory_space<vmem>>, vector<4x32xf32>,
    } else {
    }
    %c0 = arith.constant 0 : index
    %c0_1 = arith.constant 0 : index
    %5 = vector.load %arg3[%c0, %c0_1] : memref<8x32xf32, #tpu.memory_space<vmem>>, vector<8x32xf32>
    %6 = arith.mulf %5, %5 : vector<8x32xf32>
    %cst = arith.constant dense<0.000000e+00> : vector<8xf32>
    %7 = vector.multi_reduction <add>, %6, %cst [1] : vector<8x32xf32> to vector<8xf32>
    %8 = vector.shape_cast %7 : vector<8xf32> to vector<8x1xf32>
    %cst_2 = arith.constant 1.000000e-24 : f32
    %9 = vector.broadcast %cst_2 : f32 to vector<8x1xf32>
    %10 = arith.maximumf %8, %9 : vector<8x1xf32>
    %11 = math.rsqrt %10 : vector<8x1xf32>
    %c0_3 = arith.constant 0 : index
    %c0_4 = arith.constant 0 : index
    %12 = vector.load %arg6[%c0_3, %c0_4] : memref<4x32xf32, #tpu.memory_space<vmem>>, vector<4x32xf32>
    %cst_5 = arith.constant dense<0.000000e+00> : vector<8x4xf32>
    %13 = tpu.matmul %5, %12, %cst_5 {dimension_numbers = #tpu.dot_dimension_numbers<[1], [1], [0], [0], [0, 0, 1, 0], [], []>} : vector<8x32xf32>, vector<4x32xf32>, vector<8x4xf32> -> vector<8x4xf32>
    %14 = vector.broadcast %11 : vector<8x1xf32> to vector<8x4xf32>
    %15 = arith.mulf %13, %14 : vector<8x4xf32>
    %cst_6 = arith.constant 2.000000e+00 : f32
    %16 = vector.broadcast %cst_6 : f32 to vector<8x4xf32>
    %17 = arith.mulf %16, %15 : vector<8x4xf32>
    %cst_7 = arith.constant 2.000000e+00 : f32
    %18 = vector.broadcast %cst_7 : f32 to vector<8x4xf32>
    %19 = arith.subf %18, %17 : vector<8x4xf32>
    %cst_8 = arith.constant 0.000000e+00 : f32
    %cst_9 = arith.constant 4.000000e+00 : f32
    %20 = vector.broadcast %cst_8 : f32 to vector<8x4xf32>
    %21 = arith.maximumf %20, %19 : vector<8x4xf32>
    %22 = vector.broadcast %cst_9 : f32 to vector<8x4xf32>
    %23 = arith.minimumf %22, %21 : vector<8x4xf32>
    %24 = math.sqrt %23 : vector<8x4xf32>
    %cst_10 = arith.constant 5.000000e-01 : f32
    %25 = vector.broadcast %cst_10 : f32 to vector<8x4xf32>
    %26 = arith.mulf %25, %24 : vector<8x4xf32>
    %cst_11 = arith.constant 1.000000e+00 : f32
    %27 = vector.broadcast %cst_11 : f32 to vector<8x4xf32>
    %28 = arith.minimumf %26, %27 : vector<8x4xf32>
    %cst_12 = arith.constant -0.0012624911 : f32
    %29 = vector.broadcast %cst_12 : f32 to vector<8x4xf32>
    %30 = arith.mulf %29, %28 : vector<8x4xf32>
    %cst_13 = arith.constant 6.670090e-03 : f32
    %31 = vector.broadcast %cst_13 : f32 to vector<8x4xf32>
    %32 = arith.addf %30, %31 : vector<8x4xf32>
    %33 = arith.mulf %32, %28 : vector<8x4xf32>
    %cst_14 = arith.constant -0.0170881264 : f32
    %34 = vector.broadcast %cst_14 : f32 to vector<8x4xf32>
    %35 = arith.addf %33, %34 : vector<8x4xf32>
    %36 = arith.mulf %35, %28 : vector<8x4xf32>
    %cst_15 = arith.constant 0.0308918804 : f32
    %37 = vector.broadcast %cst_15 : f32 to vector<8x4xf32>
    %38 = arith.addf %36, %37 : vector<8x4xf32>
    %39 = arith.mulf %38, %28 : vector<8x4xf32>
    %cst_16 = arith.constant -0.0501743034 : f32
    %40 = vector.broadcast %cst_16 : f32 to vector<8x4xf32>
    %41 = arith.addf %39, %40 : vector<8x4xf32>
    %42 = arith.mulf %41, %28 : vector<8x4xf32>
    %cst_17 = arith.constant 0.0889789909 : f32
    %43 = vector.broadcast %cst_17 : f32 to vector<8x4xf32>
    %44 = arith.addf %42, %43 : vector<8x4xf32>
    %45 = arith.mulf %44, %28 : vector<8x4xf32>
    %cst_18 = arith.constant -0.214598805 : f32
    %46 = vector.broadcast %cst_18 : f32 to vector<8x4xf32>
    %47 = arith.addf %45, %46 : vector<8x4xf32>
    %48 = arith.mulf %47, %28 : vector<8x4xf32>
    %cst_19 = arith.constant 1.57079625 : f32
    %49 = vector.broadcast %cst_19 : f32 to vector<8x4xf32>
    %50 = arith.addf %48, %49 : vector<8x4xf32>
    %cst_20 = arith.constant 1.000000e+00 : f32
    %51 = vector.broadcast %cst_20 : f32 to vector<8x4xf32>
    %52 = arith.subf %51, %28 : vector<8x4xf32>
    %cst_21 = arith.constant 0.000000e+00 : f32
    %53 = vector.broadcast %cst_21 : f32 to vector<8x4xf32>
    %54 = arith.maximumf %52, %53 : vector<8x4xf32>
    %55 = math.sqrt %54 : vector<8x4xf32>
    %56 = arith.mulf %55, %50 : vector<8x4xf32>
    %cst_22 = arith.constant 1.57079637 : f32
    %57 = vector.broadcast %cst_22 : f32 to vector<8x4xf32>
    %58 = arith.subf %57, %56 : vector<8x4xf32>
    %59 = arith.mulf %58, %58 : vector<8x4xf32>
    %cst_23 = arith.constant 2.000000e+00 : f32
    %60 = vector.broadcast %cst_23 : f32 to vector<8x4xf32>
    %61 = arith.mulf %60, %59 : vector<8x4xf32>
    %c1_i32_24 = arith.constant 1 : i32
    %62 = arith.addi %1, %c1_i32_24 : i32
    %c8_i32 = arith.constant 8 : i32
    %63 = arith.muli %62, %c8_i32 : i32
    %c8_i32_25 = arith.constant 8 : i32
    %64 = arith.cmpi sgt, %63, %c8_i32_25 : i32
    %true = arith.constant true
    %65 = arith.xori %64, %true : i1
    %66 = arith.extui %65 : i1 to i32
    %c0_i32_26 = arith.constant 0 : i32
    %67 = arith.cmpi ne, %66, %c0_i32_26 : i32
    scf.if %67 {
      %c0_30 = arith.constant 0 : index
      %c0_31 = arith.constant 0 : index
      %73 = vector.load %arg7[%c0_30, %c0_31] : memref<8x4xf32, #tpu.memory_space<vmem>>, vector<8x4xf32>
      %74 = arith.addf %73, %61 : vector<8x4xf32>
      %c0_32 = arith.constant 0 : index
      %c0_33 = arith.constant 0 : index
      %75 = vector.load %arg7[%c0_32, %c0_33] : memref<8x4xf32, #tpu.memory_space<vmem>>, vector<8x4xf32>
      tpu.vector_store %arg7[%c0_32, %c0_33], %74 {strides = array<i32>} : memref<8x4xf32, #tpu.memory_space<vmem>>, vector<8x4xf32>,
    } else {
    }
    %68 = arith.extui %64 : i1 to i32
    %c0_i32_27 = arith.constant 0 : i32
    %69 = arith.cmpi ne, %68, %c0_i32_27 : i32
    scf.if %69 {
      %c8_i32_30 = arith.constant 8 : i32
      %73 = arith.muli %1, %c8_i32_30 : i32
      %74 = tpu.iota {dimensions = array<i32: 0>} : vector<8x4xi32>
      %75 = vector.broadcast %73 : i32 to vector<8x4xi32>
      %76 = arith.addi %75, %74 : vector<8x4xi32>
      %c0_31 = arith.constant 0 : index
      %c0_32 = arith.constant 0 : index
      %77 = vector.load %arg7[%c0_31, %c0_32] : memref<8x4xf32, #tpu.memory_space<vmem>>, vector<8x4xf32>
      %c8_i32_33 = arith.constant 8 : i32
      %78 = vector.broadcast %c8_i32_33 : i32 to vector<8x4xi32>
      %79 = arith.cmpi slt, %76, %78 : vector<8x4xi32>
      %cst_34 = arith.constant 0.000000e+00 : f32
      %80 = vector.broadcast %cst_34 : f32 to vector<8x4xf32>
      %81 = arith.select %79, %61, %80 : vector<8x4xi1>, vector<8x4xf32>
      %82 = arith.addf %77, %81 : vector<8x4xf32>
      %c0_35 = arith.constant 0 : index
      %c0_36 = arith.constant 0 : index
      %83 = vector.load %arg7[%c0_35, %c0_36] : memref<8x4xf32, #tpu.memory_space<vmem>>, vector<8x4xf32>
      tpu.vector_store %arg7[%c0_35, %c0_36], %82 {strides = array<i32>} : memref<8x4xf32, #tpu.memory_space<vmem>>, vector<8x4xf32>,
    } else {
    }
    %c0_i32_28 = arith.constant 0 : i32
    %70 = arith.cmpi eq, %arg1, %c0_i32_28 : i32
    %71 = arith.extui %70 : i1 to i32
    %c0_i32_29 = arith.constant 0 : i32
    %72 = arith.cmpi ne, %71, %c0_i32_29 : i32
    scf.if %72 {
      %c0_30 = arith.constant 0 : index
      %73 = memref.load %arg2[%c0_30] : memref<1xf32, #tpu.memory_space<smem>>
      %c0_31 = arith.constant 0 : index
      %c0_32 = arith.constant 0 : index
      %74 = vector.load %arg7[%c0_31, %c0_32] : memref<8x4xf32, #tpu.memory_space<vmem>>, vector<8x4xf32>
      %cst_33 = arith.constant dense<0.000000e+00> : vector<8xf32>
      %75 = vector.multi_reduction <add>, %74, %cst_33 [1] : vector<8x4xf32> to vector<8xf32>
      %76 = vector.shape_cast %75 : vector<8xf32> to vector<8x1xf32>
      %cst_34 = arith.constant dense<0.000000e+00> : vector<1xf32>
      %77 = vector.multi_reduction <add>, %76, %cst_34 [0] : vector<8x1xf32> to vector<1xf32>
      %78 = vector.shape_cast %77 : vector<1xf32> to vector<1x1xf32>
      %cst_35 = arith.constant 3.125000e-02 : f32
      %79 = arith.mulf %73, %cst_35 : f32
      %80 = vector.broadcast %79 : f32 to vector<1x1xf32>
      %81 = arith.mulf %78, %80 : vector<1x1xf32>
      %c0_36 = arith.constant 0 : index
      %c0_37 = arith.constant 0 : index
      %82 = vector.load %arg5[%c0_36, %c0_37] : memref<1x1xf32, #tpu.memory_space<vmem>>, vector<1x1xf32>
      tpu.vector_store %arg5[%c0_36, %c0_37], %81 {strides = array<i32>} : memref<1x1xf32, #tpu.memory_space<vmem>>, vector<1x1xf32>,
    } else {
    }
    return
  }
  func.func @transform_0(%arg0: i32, %arg1: i32) -> i32 {
    %c0_i32 = arith.constant 0 : i32
    %c0_i32_0 = arith.constant 0 : i32
    return %c0_i32 : i32
  }
  func.func @transform_1(%arg0: i32, %arg1: i32) -> (i32, i32) {
    %c1_i32 = arith.constant 1 : i32
    %0 = arith.muli %arg0, %c1_i32 : i32
    %1 = arith.addi %0, %arg1 : i32
    %c0_i32 = arith.constant 0 : i32
    %c0_i32_0 = arith.constant 0 : i32
    return %1, %c0_i32 : i32, i32
  }
  func.func @transform_2(%arg0: i32, %arg1: i32) -> (i32, i32) {
    %c0_i32 = arith.constant 0 : i32
    %c0_i32_0 = arith.constant 0 : i32
    %c0_i32_1 = arith.constant 0 : i32
    return %c0_i32, %c0_i32_0 : i32, i32
  }
  func.func @transform_3(%arg0: i32, %arg1: i32) -> (i32, i32) {
    %c0_i32 = arith.constant 0 : i32
    %c0_i32_0 = arith.constant 0 : i32
    return %arg0, %c0_i32 : i32, i32
  }
}

</mosaic_0001>

<bundles_post_ra>
// kernel: prompt_forward.1
= control target key start
LH: loop header
LB: loop body
LE: loop exit
PB: predicated region body
PF: predicated region fallthrough
CT: control target
= control target key end

     0   :  { %9 = vsyncpa [#allocation6], 0  ;;  %s363_s0 = inlined_call_operand.<no memory space> [shape: f32[1], index: 0, kind: input, shape index: {}]   ;;  %s364_s1 = inlined_call_operand.hbm [shape: f32[8,32], index: 1, kind: input, shape index: {}]   ;;  %s365_s2 = inlined_call_operand.vmem [shape: f32[4,32], index: 2, kind: input, shape index: {}]   ;;  %s366_s3 = inlined_call_operand.hbm [shape: f32[1,1], index: 3, kind: output, shape index: {}]  }
   0x1   :  { %10 = vsyncpa [#allocation7], 0  ;;  %s304_s12 = smov [#allocation5]   ;;  %s256_s16 = scalar_lea.hbm %s364_s1, 128 }
   0x2   :  { %s22_s13 = sshll.u32 %s304_s12, 4  ;;  %p257_p0 = scmp.ne.s32.totalorder %s364_s1, %s256_s16  ;;  %s23_s13 = int_to_ptr.vmem [resolvable:$true] %s22_s13 }
   0x3   :  { %p260_p1 = scmp.lt.u32.totalorder %s256_s16, %s364_s1 }
   0x5   :  { %p262_p2 = pnand %p260_p1, %p257_p0 }
   0x7   :  { %265 = shalt.err (!%p262_p2)
}
   0x8   :  { %s266_s21 = scalar_lea.vmem %s23_s13, 128  ;;  %p271_p4 = scmp.lt.s32.totalorder %s23_s13, %s23_s13 }
   0x9   :  { %p267_p3 = scmp.ne.s32.totalorder %s23_s13, %s266_s21  ;;  %p272_p5 = scmp.lt.s32.totalorder %s266_s21, %s266_s21 }
   0xb   :  { %p273_p6 = por %p272_p5, %p271_p4 }
   0xd   :  { %p274_p7 = pnand %p273_p6, %p267_p3 }
   0xf   :  { %277 = shalt.err (!%p274_p7)
}
  0x10   :  { %25 = dma.hbm_to_vmem [thread:$0]  %s364_s1, 128, %s23_s13, [#allocation6]  }
  0x11   :  { %300 = dma.done.wait [#allocation6], 128  }
  0x12   :  { %301 = vsyncadd [#allocation6], 4294967168  ;;  %v39_v0 = vld [vmem:[%s365_s2] sm:$0xf]  ;;  %vm41_vm0 = vcmask 257024   ;;  %v305_v3 = vmov 0.0  }
  0x13   :  { %v40_v1 = vmul.f32 %v39_v0, %v39_v0  ;;  %239 = vmatprep.subr.mxu0 %v305_v3  ;;  %vm306_vm1 = vmmov 0   ;;  %v49_v4 = vld [vmem:[#allocation5] sm:$0xff]  ;;  %vm51_vm2 = vcmask 261120   ;;  %vm37_vm3 = vcmask 31744   ;;  %s215_s26 = smul.f32 0.03125, %s363_s0  ;;  %s307_s27 = smov [#allocation8]  }
  0x14   :  { %241 = vmatprep.mubr.msk.f32.mxu0 %vm306_vm1, %v305_v3  ;;  %v50_v5 = vmul.f32 %v49_v4, %v49_v4  ;;  %38 = vst.msk [vmem:[#allocation3] sm:$0xff] %vm37_vm3, %v305_v3  ;;  %s226_s28 = sshll.u32 %s307_s27, 4  ;;  %vm218_vm8 = vcmask 0   ;;  %s227_s28 = int_to_ptr.vmem [resolvable:$true] %s226_s28 }
  0x15   :  { %v42_v2 = vsel %vm41_vm0, %v40_v1, 0.0  ;;  %s278_s29 = scalar_lea.vmem %s227_s28, 16  ;;  %s282_s30 = scalar_lea.vmem %s227_s28, 32 }
  0x16   :  { %43 = vadd.xlane.f32.xlu0 %v42_v2  ;;  %v52_v6 = vsel %vm51_vm2, %v50_v5, 0.0  ;;  %p279_p8 = scmp.ne.s32.totalorder %s227_s28, %s278_s29  ;;  %p283_p9 = scmp.lt.s32.totalorder %s227_s28, %s227_s28 }
  0x17   :  { %p284_p10 = scmp.lt.s32.totalorder %s282_s30, %s278_s29 }
  0x19   :  { %p285_p11 = por %p284_p10, %p283_p9 }
  0x1a   :  { %53 = vadd.xlane.f32.xlu0 %v52_v6 }
  0x1b   :  { %v182_v53 = vld [vmem:[#allocation3] sm:$0xff]  ;;  %p286_p12 = pnand %p285_p11, %p279_p8 }
  0xa3   :  { %v44_v7 = vpop.xlane.xlu0 %43 }
  0xa4   :  { %v45_v8 = vmax.f32 %v44_v7, 1e-24 }
  0xa6   :  { %248 = vrsqrt.f32 %v45_v8 }
  0xa7   :  { %v54_v12 = vpop.xlane.xlu0 %53 }
  0xa8   :  { %v55_v13 = vmax.f32 %v54_v12, 1e-24 }
  0xaa   :  { %250 = vrsqrt.f32 %v55_v13 }
  0xb0   :  { %v249_v9 = vpop.eup %248 }
  0xb1   :  { %v47_v10 = vmul.f32 %v249_v9, %v39_v0  ;;  %v216_v0 = vstv %s215_s26 }
  0xb3   :  { %48 = vst.msk [vmem:[#allocation2] sm:$0xf] %vm41_vm0, %v47_v10 }
  0xb4   :  { %v251_v14 = vpop.eup %250 }
  0xba   :  { %v57_v11 = vld [vmem:[#allocation2] sm:$0xf] }
  0xbb   :  { %240 = vmatpush3.xpose.msk.msra.mxu0 %vm51_vm2, %v57_v11 }
  0xbe   :  { %242 = vmatmul.mubr.msk.f32.vlgmr.msra.gmra.mrb[0].mxu0 %vm51_vm2, %v49_v4 }
 0x191   :  { %v130_v15 = vpop.f32.mrb[0].mxu0 }
 0x192   :  { %v134_v16 = vmul.f32 %v251_v14, %v130_v15  ;;  %v243_v17 = vpop.f32.mrb[1].mxu0 }
 0x194   :  { %v135_v18 = vmul.f32 2.0, %v134_v16 }
 0x196   :  { %v136_v19 = vsub.f32 2.0, %v135_v18 }
 0x198   :  { %v137_v20 = vmax.f32 %v136_v19, 0.0 }
 0x19a   :  { %v138_v21 = vmin.f32 %v137_v20, 4.0 }
 0x19c   :  { %252 = vrsqrt.f32 %v138_v21  ;;  %vm141_vm4 = vcmp.eq.f32.partialorder %v138_v21, inf  ;;  %v144_v24 = vand.u32 2147483648, %v138_v21  ;;  %vm143_vm5 = vcmp.eq.f32.partialorder %v138_v21, 0.0 }
 0x1a6   :  { %v253_v22 = vpop.eup %252 }
 0x1a7   :  { %v140_v23 = vmul.f32 %v253_v22, %v138_v21 }
 0x1a9   :  { %v142_v25 = vsel %vm141_vm4, %v138_v21, %v140_v23 }
 0x1aa   :  { %v145_v26 = vsel %vm143_vm5, %v144_v24, %v142_v25 }
 0x1ab   :  { %v146_v27 = vmul.f32 0.5, %v145_v26 }
 0x1ad   :  { %v147_v28 = vmin.f32 %v146_v27, 1.0 }
 0x1af   :  { %v148_v29 = vmul.f32 -0.0012624911, %v147_v28  ;;  %v162_v30 = vsub.f32 1.0, %v147_v28 }
 0x1b1   :  { %v149_v31 = vadd.f32 0.00667009, %v148_v29  ;;  %v163_v32 = vmax.f32 %v162_v30, 0.0 }
 0x1b3   :  { %v150_v33 = vmul.f32 %v149_v31, %v147_v28  ;;  %254 = vrsqrt.f32 %v163_v32  ;;  %vm166_vm6 = vcmp.eq.f32.partialorder %v163_v32, inf  ;;  %v169_v47 = vand.u32 2147483648, %v163_v32 }
 0x1b4   :  { %vm168_vm7 = vcmp.eq.f32.partialorder %v163_v32, 0.0 }
 0x1b5   :  { %v151_v34 = vadd.f32 -0.017088126, %v150_v33 }
 0x1b7   :  { %v152_v35 = vmul.f32 %v151_v34, %v147_v28 }
 0x1b9   :  { %v153_v36 = vadd.f32 0.03089188, %v152_v35 }
 0x1bb   :  { %v154_v37 = vmul.f32 %v153_v36, %v147_v28 }
 0x1bd   :  { %v155_v38 = vadd.f32 -0.050174303, %v154_v37  ;;  %v255_v40 = vpop.eup %254 }
 0x1be   :  { %v165_v43 = vmul.f32 %v255_v40, %v163_v32 }
 0x1bf   :  { %v156_v39 = vmul.f32 %v155_v38, %v147_v28 }
 0x1c0   :  { %v167_v46 = vsel %vm166_vm6, %v163_v32, %v165_v43 }
 0x1c1   :  { %v157_v41 = vadd.f32 0.08897899, %v156_v39  ;;  %v170_v49 = vsel %vm168_vm7, %v169_v47, %v167_v46 }
 0x1c3   :  { %v158_v42 = vmul.f32 %v157_v41, %v147_v28 }
 0x1c5   :  { %v159_v44 = vadd.f32 -0.2145988, %v158_v42 }
 0x1c7   :  { %v160_v45 = vmul.f32 %v159_v44, %v147_v28 }
 0x1c9   :  { %v161_v48 = vadd.f32 1.5707963, %v160_v45 }
 0x1cb   :  { %v171_v50 = vmul.f32 %v170_v49, %v161_v48 }
 0x1cd   :  { %v172_v51 = vsub.f32 1.5707964, %v171_v50 }
 0x1cf   :  { %v173_v52 = vmul.f32 %v172_v51, %v172_v51 }
 0x1d1   :  { %v174_v54 = vmul.f32 2.0, %v173_v52 }
 0x1d3   :  { %v183_v55 = vadd.f32 %v182_v53, %v174_v54 }
 0x1d5   :  { %185 = vst.msk [vmem:[#allocation3] sm:$0xff] %vm37_vm3, %v183_v55 }
 0x1dc   :  { %v204_v56 = vld [vmem:[#allocation3] sm:$0xff] }
 0x1dd   :  { %v206_v57 = vsel %vm37_vm3, %v204_v56, 0.0 }
 0x1de   :  { %207 = vadd.xlane.f32.xlu1 %v206_v57 }
 0x26b   :  { %v208_v58 = vpop.xlane.xlu1 %207 }
 0x26c   :  { %v209_v59 = vrot.slane %v208_v58, 4 }
 0x26e   :  { %v210_v60 = vadd.f32 %v209_v59, %v208_v58 }
 0x270   :  { %v211_v61 = vrot.slane %v210_v60, 2 }
 0x272   :  { %v212_v62 = vadd.f32 %v211_v61, %v210_v60 }
 0x274   :  { %v213_v63 = vrot.slane %v212_v62, 1 }
 0x276   :  { %v214_v1 = vadd.f32 %v213_v63, %v212_v62 }
 0x278   :  { %v217_v2 = vmul.f32 %v216_v0, %v214_v1 }
 0x27a   :  { %219 = vst.msk [vmem:[#allocation8] sm:$0x1] %vm218_vm8, %v217_v2 }
 0x27b   :  { %289 = shalt.err (!%p286_p12)
}
 0x27c   :  { %s290_s5 = scalar_lea.hbm %s366_s3, 16 }
 0x27d   :  { %p291_p13 = scmp.ne.s32.totalorder %s366_s3, %s290_s5  ;;  %p294_p0 = scmp.lt.u32.totalorder %s290_s5, %s366_s3 }
 0x27f   :  { %p296_p1 = pnand %p294_p0, %p291_p13 }
 0x281   :  { %299 = shalt.err (!%p296_p1)
}
 0x282   :  { %229 = dma.vmem_to_hbm [thread:$0]  %s227_s28, 16, %s366_s3, [#allocation7]  }
 0x283   :  { %302 = dma.done.wait [#allocation7], 16  }
 0x284   :  { %303 = vsyncadd [#allocation7], 4294967280 }
 0x285   :  { %233 = vsyncpa [#allocation6], 1 }
 0x286   :  { %234 = vsyncpa [#allocation7], 1 }

</bundles_post_ra>
